<compile_context>
chip_gen: v7x
topology: tpu7x:2x2x1
jax: 0.10.0
libtpu: 0.0.40
codegen_flags: <defaults>
</compile_context>

<pallas_src>
import jax
import jax.numpy as jnp
from jax.experimental import pallas as pl
from jax.experimental.pallas import tpu as pltpu

LANE = 128
SUBLANE = 8


def _round_up(x, m):
    return (x + m - 1) // m * m


def dqn_kernel(x_ref, w1_ref, b1_ref, w2_ref, b2_ref, w3_ref, b3_ref, o_ref):
    # x_ref: (Bt, Fp) bf16; w*_ref: bf16, lane-padded; b*_ref: (1, 128) f32.
    x = x_ref[...]
    h1 = jnp.dot(x, w1_ref[...], preferred_element_type=jnp.float32) + b1_ref[...]
    h1 = jnp.maximum(h1, 0.0)                                   # relu(fc1), f32
    h2 = jnp.dot(h1.astype(w2_ref.dtype), w2_ref[...],
                 preferred_element_type=jnp.float32) + b2_ref[...]
    h2 = jnp.maximum(h2, 0.0)                                   # relu(fc2), f32
    o_ref[...] = (jnp.dot(h2.astype(w3_ref.dtype), w3_ref[...],
                          preferred_element_type=jnp.float32)
                  + b3_ref[...])                                # out, lane-dense f32 store


def _pad_params(params, f_in_padded, compute_dtype):
    """Zero-pad weights/biases so every in/out feature dim is lane-dense (128)."""
    w1, b1 = params["w1"], params["b1"]
    w2, b2 = params["w2"], params["b2"]
    w3, b3 = params["w3"], params["b3"]

    h1 = _round_up(w1.shape[1], LANE)       # 24  -> 128
    h2 = _round_up(w2.shape[1], LANE)       # 32  -> 128
    no = _round_up(w3.shape[1], LANE)       # 2   -> 128

    def pad_w(w, rows, cols):
        out = jnp.zeros((rows, cols), compute_dtype)
        return out.at[: w.shape[0], : w.shape[1]].set(w.astype(compute_dtype))

    def pad_b(b, cols):
        out = jnp.zeros((1, cols), jnp.float32)
        return out.at[:, : b.shape[1]].set(b.astype(jnp.float32))

    return (pad_w(w1, f_in_padded, h1), pad_b(b1, h1),
            pad_w(w2, h1, h2),          pad_b(b2, h2),
            pad_w(w3, h2, no),          pad_b(b3, no))


def dqn_forward(x_nchw, params, *, compute_dtype=jnp.bfloat16, max_block_batch=256):
    """x_nchw: (B, 3, H, W) float32. params: dict of (in,out) weights + (1,out) biases."""
    B = x_nchw.shape[0]
    x_flat = x_nchw.reshape(B, -1)          # == torch flatten(start_dim=1)
    F_in = x_flat.shape[1]
    n_out = params["w3"].shape[1]

    # Lane-pad the feature dim and batch-pad to the tile size.
    Fp = _round_up(F_in, LANE)
    Bt = min(max_block_batch, _round_up(B, SUBLANE))
    B_pad = _round_up(B, Bt)

    x_p = jnp.zeros((B_pad, Fp), compute_dtype)
    x_p = x_p.at[:B, :F_in].set(x_flat.astype(compute_dtype))

    w1p, b1p, w2p, b2p, w3p, b3p = _pad_params(params, Fp, compute_dtype)
    NO = w3p.shape[1]

    grid = (pl.cdiv(B_pad, Bt),)

    def resident(shape):
        # Weights/biases: same block every grid step -> stay in VMEM.
        return pl.BlockSpec(shape, lambda i: (0, 0))

    out = pl.pallas_call(
        dqn_kernel,
        out_shape=jax.ShapeDtypeStruct((B_pad, NO), jnp.float32),
        grid=grid,
        in_specs=[
            pl.BlockSpec((Bt, Fp), lambda i: (i, 0)),   # x tile, double-buffered
            resident(w1p.shape), resident(b1p.shape),
            resident(w2p.shape), resident(b2p.shape),
            resident(w3p.shape), resident(b3p.shape),
        ],
        out_specs=pl.BlockSpec((Bt, NO), lambda i: (i, 0)),
        compiler_params=pltpu.CompilerParams(
            dimension_semantics=("parallel",),
        ),
    )(x_p, w1p, b1p, w2p, b2p, w3p, b3p)

    return out[:B, :n_out]


def init_params(img_height, img_width, key):
    """Deterministic init mimicking nn.Linear's default U(-1/sqrt(fan_in), +)."""
    in_f = img_height * img_width * 3
    dims = [(in_f, 24), (24, 32), (32, 2)]
    params = {}
    for i, (fan_in, fan_out) in enumerate(dims, start=1):
        key, kw, kb = jax.random.split(key, 3)
        bound = 1.0 / (fan_in ** 0.5)
        # stored as (in, out) so kernel computes x @ W  (== x @ W_torch.T)
        params[f"w{i}"] = jax.random.uniform(
            kw, (fan_in, fan_out), jnp.float32, -bound, bound)
        params[f"b{i}"] = jax.random.uniform(
            kb, (1, fan_out), jnp.float32, -bound, bound)
    return params


if __name__ == "__main__":
    key = jax.random.PRNGKey(0)
    k_params, k_x = jax.random.split(key)

    img_height, img_width, batch = 16, 16, 2
    params = init_params(img_height, img_width, k_params)

    # layout: NCHW, matching the PyTorch module's expected input.
    x = jax.random.normal(k_x, (batch, 3, img_height, img_width), jnp.float32)

    q_values = dqn_forward(x, params)
    jax.block_until_ready(q_values)

    # Sanity check against a plain-JAX reference using the same bf16-input /
    # f32-accumulation precision recipe as the kernel.
    xf = x.reshape(batch, -1).astype(jnp.bfloat16)
    w1b = params["w1"].astype(jnp.bfloat16)
    w2b = params["w2"].astype(jnp.bfloat16)
    w3b = params["w3"].astype(jnp.bfloat16)
    ref = jnp.maximum(
        jnp.dot(xf, w1b, preferred_element_type=jnp.float32) + params["b1"], 0.0)
    ref = jnp.maximum(
        jnp.dot(ref.astype(jnp.bfloat16), w2b,
                preferred_element_type=jnp.float32) + params["b2"], 0.0)
    ref = (jnp.dot(ref.astype(jnp.bfloat16), w3b,
                   preferred_element_type=jnp.float32) + params["b3"])

    assert q_values.shape == (batch, 2)
    assert jnp.allclose(q_values, ref, atol=2e-2, rtol=2e-2), (q_values, ref)

    print("KERNEL_OK")
</pallas_src>

<mosaic_0001>
module attributes {stable_mosaic.version = 11 : i64} {
  func.func @dqn_kernel(%arg0: i32, %arg1: memref<8x768xbf16, #tpu.memory_space<vmem>>, %arg2: memref<768x128xbf16, #tpu.memory_space<vmem>>, %arg3: memref<1x128xf32, #tpu.memory_space<vmem>>, %arg4: memref<128x128xbf16, #tpu.memory_space<vmem>>, %arg5: memref<1x128xf32, #tpu.memory_space<vmem>>, %arg6: memref<128x128xbf16, #tpu.memory_space<vmem>>, %arg7: memref<1x128xf32, #tpu.memory_space<vmem>>, %arg8: memref<8x128xf32, #tpu.memory_space<vmem>>) attributes {dimension_semantics = [#tpu.dimension_semantics<parallel>], iteration_bounds = array<i64: 1>, scalar_prefetch = 0 : i64, scratch_operands = 0 : i64, tpu.core_type = #tpu.core_type<tc>, window_params = [{transform_indices = @transform_0, window_bounds = array<i64: 8, 768>}, {pipeline_mode = #tpu.pipeline_mode<synchronous>, transform_indices = @transform_1, window_bounds = array<i64: 768, 128>}, {pipeline_mode = #tpu.pipeline_mode<synchronous>, transform_indices = @transform_2, window_bounds = array<i64: 1, 128>}, {pipeline_mode = #tpu.pipeline_mode<synchronous>, transform_indices = @transform_3, window_bounds = array<i64: 128, 128>}, {pipeline_mode = #tpu.pipeline_mode<synchronous>, transform_indices = @transform_4, window_bounds = array<i64: 1, 128>}, {pipeline_mode = #tpu.pipeline_mode<synchronous>, transform_indices = @transform_5, window_bounds = array<i64: 128, 128>}, {pipeline_mode = #tpu.pipeline_mode<synchronous>, transform_indices = @transform_6, window_bounds = array<i64: 1, 128>}, {transform_indices = @transform_7, window_bounds = array<i64: 8, 128>}]} {
    %c0 = arith.constant 0 : index
    %c0_0 = arith.constant 0 : index
    %0 = vector.load %arg1[%c0, %c0_0] : memref<8x768xbf16, #tpu.memory_space<vmem>>, vector<8x768xbf16>
    %c0_1 = arith.constant 0 : index
    %c0_2 = arith.constant 0 : index
    %1 = vector.load %arg2[%c0_1, %c0_2] : memref<768x128xbf16, #tpu.memory_space<vmem>>, vector<768x128xbf16>
    %cst = arith.constant dense<0.000000e+00> : vector<8x128xf32>
    %2 = tpu.matmul %0, %1, %cst {dimension_numbers = #tpu.dot_dimension_numbers<[1], [0], [0], [1], [0, 0, 1, 1], [], []>} : vector<8x768xbf16>, vector<768x128xbf16>, vector<8x128xf32> -> vector<8x128xf32>
    %c0_3 = arith.constant 0 : index
    %c0_4 = arith.constant 0 : index
    %3 = vector.load %arg3[%c0_3, %c0_4] : memref<1x128xf32, #tpu.memory_space<vmem>>, vector<1x128xf32>
    %4 = vector.broadcast %3 : vector<1x128xf32> to vector<8x128xf32>
    %5 = arith.addf %2, %4 : vector<8x128xf32>
    %cst_5 = arith.constant 0.000000e+00 : f32
    %6 = vector.broadcast %cst_5 : f32 to vector<8x128xf32>
    %7 = arith.maximumf %5, %6 : vector<8x128xf32>
    %8 = arith.truncf %7 : vector<8x128xf32> to vector<8x128xbf16>
    %c0_6 = arith.constant 0 : index
    %c0_7 = arith.constant 0 : index
    %9 = vector.load %arg4[%c0_6, %c0_7] : memref<128x128xbf16, #tpu.memory_space<vmem>>, vector<128x128xbf16>
    %cst_8 = arith.constant dense<0.000000e+00> : vector<8x128xf32>
    %10 = tpu.matmul %8, %9, %cst_8 {dimension_numbers = #tpu.dot_dimension_numbers<[1], [0], [0], [1], [0, 0, 1, 1], [], []>} : vector<8x128xbf16>, vector<128x128xbf16>, vector<8x128xf32> -> vector<8x128xf32>
    %c0_9 = arith.constant 0 : index
    %c0_10 = arith.constant 0 : index
    %11 = vector.load %arg5[%c0_9, %c0_10] : memref<1x128xf32, #tpu.memory_space<vmem>>, vector<1x128xf32>
    %12 = vector.broadcast %11 : vector<1x128xf32> to vector<8x128xf32>
    %13 = arith.addf %10, %12 : vector<8x128xf32>
    %cst_11 = arith.constant 0.000000e+00 : f32
    %14 = vector.broadcast %cst_11 : f32 to vector<8x128xf32>
    %15 = arith.maximumf %13, %14 : vector<8x128xf32>
    %16 = arith.truncf %15 : vector<8x128xf32> to vector<8x128xbf16>
    %c0_12 = arith.constant 0 : index
    %c0_13 = arith.constant 0 : index
    %17 = vector.load %arg6[%c0_12, %c0_13] : memref<128x128xbf16, #tpu.memory_space<vmem>>, vector<128x128xbf16>
    %cst_14 = arith.constant dense<0.000000e+00> : vector<8x128xf32>
    %18 = tpu.matmul %16, %17, %cst_14 {dimension_numbers = #tpu.dot_dimension_numbers<[1], [0], [0], [1], [0, 0, 1, 1], [], []>} : vector<8x128xbf16>, vector<128x128xbf16>, vector<8x128xf32> -> vector<8x128xf32>
    %c0_15 = arith.constant 0 : index
    %c0_16 = arith.constant 0 : index
    %19 = vector.load %arg7[%c0_15, %c0_16] : memref<1x128xf32, #tpu.memory_space<vmem>>, vector<1x128xf32>
    %20 = vector.broadcast %19 : vector<1x128xf32> to vector<8x128xf32>
    %21 = arith.addf %18, %20 : vector<8x128xf32>
    %c0_17 = arith.constant 0 : index
    %c0_18 = arith.constant 0 : index
    %22 = vector.load %arg8[%c0_17, %c0_18] : memref<8x128xf32, #tpu.memory_space<vmem>>, vector<8x128xf32>
    tpu.vector_store %arg8[%c0_17, %c0_18], %21 {strides = array<i32>} : memref<8x128xf32, #tpu.memory_space<vmem>>, vector<8x128xf32>,
    return
  }
  func.func @transform_0(%arg0: i32) -> (i32, i32) {
    %c0_i32 = arith.constant 0 : i32
    %c0_i32_0 = arith.constant 0 : i32
    return %arg0, %c0_i32 : i32, i32
  }
  func.func @transform_1(%arg0: i32) -> (i32, i32) {
    %c0_i32 = arith.constant 0 : i32
    %c0_i32_0 = arith.constant 0 : i32
    %c0_i32_1 = arith.constant 0 : i32
    return %c0_i32, %c0_i32_0 : i32, i32
  }
  func.func @transform_2(%arg0: i32) -> (i32, i32) {
    %c0_i32 = arith.constant 0 : i32
    %c0_i32_0 = arith.constant 0 : i32
    %c0_i32_1 = arith.constant 0 : i32
    return %c0_i32, %c0_i32_0 : i32, i32
  }
  func.func @transform_3(%arg0: i32) -> (i32, i32) {
    %c0_i32 = arith.constant 0 : i32
    %c0_i32_0 = arith.constant 0 : i32
    %c0_i32_1 = arith.constant 0 : i32
    return %c0_i32, %c0_i32_0 : i32, i32
  }
  func.func @transform_4(%arg0: i32) -> (i32, i32) {
    %c0_i32 = arith.constant 0 : i32
    %c0_i32_0 = arith.constant 0 : i32
    %c0_i32_1 = arith.constant 0 : i32
    return %c0_i32, %c0_i32_0 : i32, i32
  }
  func.func @transform_5(%arg0: i32) -> (i32, i32) {
    %c0_i32 = arith.constant 0 : i32
    %c0_i32_0 = arith.constant 0 : i32
    %c0_i32_1 = arith.constant 0 : i32
    return %c0_i32, %c0_i32_0 : i32, i32
  }
  func.func @transform_6(%arg0: i32) -> (i32, i32) {
    %c0_i32 = arith.constant 0 : i32
    %c0_i32_0 = arith.constant 0 : i32
    %c0_i32_1 = arith.constant 0 : i32
    return %c0_i32, %c0_i32_0 : i32, i32
  }
  func.func @transform_7(%arg0: i32) -> (i32, i32) {
    %c0_i32 = arith.constant 0 : i32
    %c0_i32_0 = arith.constant 0 : i32
    return %arg0, %c0_i32 : i32, i32
  }
}

</mosaic_0001>

<bundles_post_ra>
// kernel: tpu_custom_call.1
= control target key start
LH: loop header
LB: loop body
LE: loop exit
PB: predicated region body
PF: predicated region fallthrough
CT: control target
= control target key end

     0   :  { %12 = vsyncpa [#allocation3], 0  ;;  %s1399_s0 = inlined_call_operand.hbm [shape: bf16[8,768], index: 0, kind: input, shape index: {}]   ;;  %s1400_s1 = inlined_call_operand.hbm [shape: bf16[768,128], index: 1, kind: input, shape index: {}]   ;;  %s1401_s2 = inlined_call_operand.vmem [shape: f32[1,128], index: 2, kind: input, shape index: {}]   ;;  %s1402_s3 = inlined_call_operand.hbm [shape: bf16[128,128], index: 3, kind: input, shape index: {}]   ;;  %s1403_s4 = inlined_call_operand.vmem [shape: f32[1,128], index: 4, kind: input, shape index: {}]   ;;  %s1404_s5 = inlined_call_operand.hbm [shape: bf16[128,128], index: 5, kind: input, shape index: {}]   ;;  %s1405_s6 = inlined_call_operand.vmem [shape: f32[1,128], index: 6, kind: input, shape index: {}]   ;;  %s1406_s7 = inlined_call_operand.hbm [shape: f32[8,128], index: 7, kind: output, shape index: {}]  }
   0x1   :  { %13 = vsyncpa [#allocation6], 0 }
   0x2   :  { %14 = vsyncpa [#allocation9], 0 }
   0x3   :  { %15 = vsyncpa [#allocation4], 0  ;;  %s1254_s24 = smov [#allocation5]   ;;  %s1136_s28 = scalar_lea.hbm %s1400_s1, 6144 }
   0x4   :  { %s31_s25 = sshll.u32 %s1254_s24, 4  ;;  %p1137_p0 = scmp.ne.s32.totalorder %s1400_s1, %s1136_s28  ;;  %s32_s25 = int_to_ptr.vmem [resolvable:$true] %s31_s25 }
   0x5   :  { %p1140_p1 = scmp.lt.u32.totalorder %s1136_s28, %s1400_s1 }
   0x7   :  { %p1142_p2 = pnand %p1140_p1, %p1137_p0 }
   0x9   :  { %1145 = shalt.err (!%p1142_p2)
}
   0xa   :  { %s1146_s10 = scalar_lea.vmem %s32_s25, 6144  ;;  %p1151_p4 = scmp.lt.s32.totalorder %s32_s25, %s32_s25 }
   0xb   :  { %p1147_p3 = scmp.ne.s32.totalorder %s32_s25, %s1146_s10  ;;  %p1152_p5 = scmp.lt.s32.totalorder %s1146_s10, %s1146_s10 }
   0xd   :  { %p1153_p6 = por %p1152_p5, %p1151_p4 }
   0xf   :  { %p1154_p7 = pnand %p1153_p6, %p1147_p3 }
  0x11   :  { %1157 = shalt.err (!%p1154_p7)
}
  0x12   :  { %s1255_s11 = smov 64   ;;  %s1256_s12 = smov 4  }
  0x13   :  { %37 = dma.hbm_to_vmem [thread:$0]  %s1400_s1, 6144, %s32_s25, [#allocation6], %s1255_s11, %s1255_s11, %s1256_s12  }
  0x14   :  { %s1257_s15 = smov [#allocation2]   ;;  %s1258_s17 = smov [#allocation7]  }
  0x15   :  { %s22_s16 = sshll.u32 %s1257_s15, 4  ;;  %s45_s18 = sshll.u32 %s1258_s17, 4  ;;  %s23_s16 = int_to_ptr.vmem [resolvable:$true] %s22_s16  ;;  %s46_s18 = int_to_ptr.vmem [resolvable:$true] %s45_s18 }
  0x16   :  { %s1158_s21 = scalar_lea.hbm %s1399_s0, 384 }
  0x17   :  { %p1159_p8 = scmp.ne.s32.totalorder %s1399_s0, %s1158_s21  ;;  %p1162_p9 = scmp.lt.u32.totalorder %s1158_s21, %s1399_s0 }
  0x19   :  { %p1164_p10 = pnand %p1162_p9, %p1159_p8 }
  0x1b   :  { %1167 = shalt.err (!%p1164_p10)
}
  0x1c   :  { %s1168_s1 = scalar_lea.vmem %s23_s16, 384  ;;  %p1173_p12 = scmp.lt.s32.totalorder %s23_s16, %s23_s16 }
  0x1d   :  { %p1169_p11 = scmp.ne.s32.totalorder %s23_s16, %s1168_s1  ;;  %p1174_p13 = scmp.lt.s32.totalorder %s1168_s1, %s1168_s1 }
  0x1f   :  { %p1175_p0 = por %p1174_p13, %p1173_p12 }
  0x21   :  { %p1176_p1 = pnand %p1175_p0, %p1169_p11 }
  0x23   :  { %1179 = shalt.err (!%p1176_p1)
}
  0x24   :  { %25 = dma.hbm_to_vmem [thread:$0]  %s1399_s0, 384, %s23_s16, [#allocation3]  }
  0x25   :  { %s1180_s30 = scalar_lea.hbm %s1402_s3, 1024 }
  0x26   :  { %p1181_p2 = scmp.ne.s32.totalorder %s1402_s3, %s1180_s30  ;;  %p1184_p3 = scmp.lt.u32.totalorder %s1180_s30, %s1402_s3 }
  0x28   :  { %p1186_p4 = pnand %p1184_p3, %p1181_p2 }
  0x2a   :  { %1189 = shalt.err (!%p1186_p4)
}
  0x2b   :  { %s1190_s14 = scalar_lea.vmem %s46_s18, 1024  ;;  %p1195_p6 = scmp.lt.s32.totalorder %s46_s18, %s46_s18 }
  0x2c   :  { %p1191_p5 = scmp.ne.s32.totalorder %s46_s18, %s1190_s14  ;;  %p1196_p7 = scmp.lt.s32.totalorder %s1190_s14, %s1190_s14 }
  0x2e   :  { %p1197_p8 = por %p1196_p7, %p1195_p6 }
  0x30   :  { %p1198_p9 = pnand %p1197_p8, %p1191_p5 }
  0x32   :  { %1201 = shalt.err (!%p1198_p9)
}
  0x33   :  { %51 = dma.hbm_to_vmem [thread:$0]  %s1402_s3, 1024, %s46_s18, [#allocation6], %s1255_s11, %s1255_s11, %s1256_s12  }
  0x34   :  { %s1259_s16 = smov [#allocation8]   ;;  %s1202_s21 = scalar_lea.hbm %s1404_s5, 1024 }
  0x35   :  { %s59_s17 = sshll.u32 %s1259_s16, 4  ;;  %p1203_p10 = scmp.ne.s32.totalorder %s1404_s5, %s1202_s21  ;;  %s60_s17 = int_to_ptr.vmem [resolvable:$true] %s59_s17 }
  0x36   :  { %p1206_p11 = scmp.lt.u32.totalorder %s1202_s21, %s1404_s5 }
  0x38   :  { %p1208_p12 = pnand %p1206_p11, %p1203_p10 }
  0x3a   :  { %1211 = shalt.err (!%p1208_p12)
}
  0x3b   :  { %s1212_s1 = scalar_lea.vmem %s60_s17, 1024  ;;  %p1217_p0 = scmp.lt.s32.totalorder %s60_s17, %s60_s17 }
  0x3c   :  { %p1213_p13 = scmp.ne.s32.totalorder %s60_s17, %s1212_s1  ;;  %p1218_p1 = scmp.lt.s32.totalorder %s1212_s1, %s1212_s1 }
  0x3e   :  { %p1219_p2 = por %p1218_p1, %p1217_p0 }
  0x40   :  { %p1220_p3 = pnand %p1219_p2, %p1213_p13 }
  0x42   :  { %1223 = shalt.err (!%p1220_p3)
}
  0x43   :  { %65 = dma.hbm_to_vmem [thread:$0]  %s1404_s5, 1024, %s60_s17, [#allocation9], %s1255_s11, %s1255_s11, %s1256_s12  }
  0x44   :  { %1246 = dma.done.wait [#allocation3], 384  }
  0x45   :  { %1247 = vsyncadd [#allocation3], 4294966912 }
  0x46   :  { %1248 = dma.done.wait [#allocation6], 7168  }
  0x47   :  { %1249 = vsyncadd [#allocation6], 4294960128 }
  0x48   :  { %1250 = dma.done.wait [#allocation9], 1024  }
  0x49   :  { %1251 = vsyncadd [#allocation9], 4294966272  ;;  %v1066_v0 = vld [vmem:[#allocation5 + $0x40] sm:$0xff]   ;;  %v1070_v4 = vld [vmem:[#allocation5 + $0x48] sm:$0xff]   ;;  %v1260_v58 = vmov 0.0   ;;  %vm1261_vm0 = vmmov 0  }
  0x4a   :  { %v1067_v1 = vld [vmem:[#allocation5] sm:$0xff]   ;;  %933 = vmatprep.subr.bf16.mxu0 %v1066_v0  ;;  %v1071_v5 = vld [vmem:[#allocation5 + $0x8] sm:$0xff]   ;;  %v1074_v8 = vld [vmem:[#allocation5 + $0x50] sm:$0xff]   ;;  %s1262_s28 = smov [#allocation10]  }
  0x4b   :  { %v1068_v2 = vld [vmem:[#allocation5 + $0xc0] sm:$0xff]   ;;  %934 = vmatpush3.bf16.msra.mxu0 %v1067_v1  ;;  %v1072_v6 = vld [vmem:[#allocation5 + $0xc8] sm:$0xff]   ;;  %v1075_v9 = vld [vmem:[#allocation5 + $0x10] sm:$0xff]   ;;  %s849_s29 = sshll.u32 %s1262_s28, 4  ;;  %s850_s29 = int_to_ptr.vmem [resolvable:$true] %s849_s29 }
  0x4c   :  { %v1069_v3 = vld [vmem:[#allocation5 + $0x80] sm:$0xff]   ;;  %955 = vmatprep.subr.bf16.mxu1 %v1068_v2  ;;  %935 = vmatprep.subr.bf16.mxu0 %v1070_v4  ;;  %v1073_v7 = vld [vmem:[#allocation5 + $0x88] sm:$0xff]   ;;  %v1076_v10 = vld [vmem:[#allocation5 + $0xd0] sm:$0xff]   ;;  %p1229_p5 = scmp.lt.s32.totalorder %s850_s29, %s850_s29 }
  0x4d   :  { %956 = vmatpush3.bf16.msra.mxu1 %v1069_v3  ;;  %v1077_v11 = vld [vmem:[#allocation5 + $0x90] sm:$0xff]   ;;  %v1078_v12 = vld [vmem:[#allocation5 + $0x58] sm:$0xff]   ;;  %v1082_v16 = vld [vmem:[#allocation5 + $0x60] sm:$0xff]  }
  0x4e   :  { %957 = vmatprep.subr.bf16.mxu1 %v1072_v6  ;;  %v1079_v13 = vld [vmem:[#allocation5 + $0x18] sm:$0xff]   ;;  %v1083_v17 = vld [vmem:[#allocation5 + $0x20] sm:$0xff]   ;;  %v1086_v20 = vld [vmem:[#allocation5 + $0x68] sm:$0xff]  }
  0x4f   :  { %936 = vmatpush3.bf16.msra.mxu0 %v1071_v5  ;;  %v1080_v14 = vld [vmem:[#allocation5 + $0xd8] sm:$0xff]   ;;  %v1084_v18 = vld [vmem:[#allocation5 + $0xe0] sm:$0xff]   ;;  %v1087_v21 = vld [vmem:[#allocation5 + $0x28] sm:$0xff]  }
  0x50   :  { %937 = vmatprep.subr.bf16.mxu0 %v1074_v8  ;;  %v1081_v15 = vld [vmem:[#allocation5 + $0x98] sm:$0xff]   ;;  %v1085_v19 = vld [vmem:[#allocation5 + $0xa0] sm:$0xff]   ;;  %v1088_v22 = vld [vmem:[#allocation5 + $0xe8] sm:$0xff]  }
  0x51   :  { %958 = vmatpush3.bf16.msra.mxu1 %v1073_v7  ;;  %v1089_v23 = vld [vmem:[#allocation5 + $0xa8] sm:$0xff]   ;;  %v1090_v24 = vld [vmem:[#allocation5 + $0x70] sm:$0xff]   ;;  %v1094_v28 = vld [vmem:[#allocation5 + $0x78] sm:$0xff]  }
  0x52   :  { %959 = vmatprep.subr.bf16.mxu1 %v1076_v10  ;;  %v1091_v25 = vld [vmem:[#allocation5 + $0x30] sm:$0xff]   ;;  %v1095_v29 = vld [vmem:[#allocation5 + $0x38] sm:$0xff]   ;;  %v81_v31 = vld [vmem:[#allocation2] sm:$0xff] }
  0x53   :  { %938 = vmatpush3.bf16.msra.mxu0 %v1075_v9  ;;  %v1092_v26 = vld [vmem:[#allocation5 + $0xf0] sm:$0xff]   ;;  %v1096_v30 = vld [vmem:[#allocation5 + $0xf8] sm:$0xff]   ;;  %v861_v32 = vcombine.low %v81_v31, %v81_v31  ;;  %v862_v33 = vcombine.high %v81_v31, %v81_v31  ;;  %v1100_v35 = vld [vmem:[#allocation5 + $0x140] sm:$0xff]  }
  0x54   :  { %939 = vmatprep.subr.bf16.mxu0 %v1078_v12  ;;  %v1093_v27 = vld [vmem:[#allocation5 + $0xb0] sm:$0xff]   ;;  %v1099_v34 = vld [vmem:[#allocation5 + $0xb8] sm:$0xff]   ;;  %v1103_v39 = vld [vmem:[#allocation5 + $0x100] sm:$0xff]  }
  0x55   :  { %960 = vmatpush3.bf16.msra.mxu1 %v1077_v11  ;;  %v82_v36 = vld [vmem:[#allocation2 + $0x8] sm:$0xff]  ;;  %528 = vmatprep.mubr.bf16.mxu0 %v862_v33  ;;  %v1104_v40 = vld [vmem:[#allocation5 + $0x148] sm:$0xff]   ;;  %v1108_v44 = vld [vmem:[#allocation5 + $0x158] sm:$0xff]  }
  0x56   :  { %961 = vmatprep.subr.bf16.mxu1 %v1080_v14  ;;  %v863_v37 = vcombine.low %v82_v36, %v82_v36  ;;  %v864_v38 = vcombine.high %v82_v36, %v82_v36  ;;  %v1105_v41 = vld [vmem:[#allocation5 + $0x108] sm:$0xff]   ;;  %v1106_v42 = vld [vmem:[#allocation5 + $0x150] sm:$0xff]   ;;  %v1109_v45 = vld [vmem:[#allocation5 + $0x118] sm:$0xff]  }
  0x57   :  { %940 = vmatpush3.bf16.msra.mxu0 %v1079_v13  ;;  %v1107_v43 = vld [vmem:[#allocation5 + $0x110] sm:$0xff]   ;;  %v1110_v46 = vld [vmem:[#allocation5 + $0x160] sm:$0xff]   ;;  %v1112_v48 = vld [vmem:[#allocation5 + $0x168] sm:$0xff]  }
  0x58   :  { %941 = vmatprep.subr.bf16.mxu0 %v1082_v16  ;;  %568 = vmatprep.mubr.bf16.mxu1 %v864_v38  ;;  %v1111_v47 = vld [vmem:[#allocation5 + $0x120] sm:$0xff]   ;;  %v83_v49 = vld [vmem:[#allocation2 + $0x10] sm:$0xff]  ;;  %v1113_v51 = vld [vmem:[#allocation5 + $0x128] sm:$0xff]  }
  0x59   :  { %962 = vmatpush3.bf16.msra.mxu1 %v1081_v15  ;;  %v866_v50 = vcombine.high %v83_v49, %v83_v49  ;;  %v1114_v52 = vld [vmem:[#allocation5 + $0x170] sm:$0xff]   ;;  %v1116_v54 = vld [vmem:[#allocation5 + $0x178] sm:$0xff]   ;;  %v865_v56 = vcombine.low %v83_v49, %v83_v49  ;;  %v1120_v57 = vld [vmem:[#allocation7] sm:$0xff]  }
  0x5a   :  { %963 = vmatprep.subr.bf16.mxu1 %v1084_v18  ;;  %v1115_v53 = vld [vmem:[#allocation5 + $0x130] sm:$0xff]   ;;  %v1117_v55 = vld [vmem:[#allocation5 + $0x138] sm:$0xff]   ;;  %v1121_v59 = vld [vmem:[#allocation7 + $0x8] sm:$0xff]  }
  0x5b   :  { %942 = vmatpush3.bf16.msra.mxu0 %v1083_v17  ;;  %v1122_v60 = vld [vmem:[#allocation7 + $0x10] sm:$0xff]   ;;  %v1123_v61 = vld [vmem:[#allocation7 + $0x18] sm:$0xff]   ;;  %v1124_v62 = vld [vmem:[#allocation7 + $0x20] sm:$0xff]  }
  0x5c   :  { %943 = vmatprep.subr.bf16.mxu0 %v1086_v20  ;;  %v1125_v63 = vld [vmem:[#allocation7 + $0x28] sm:$0xff]   ;;  %v1126_v0 = vld [vmem:[#allocation7 + $0x30] sm:$0xff]   ;;  %v1127_v1 = vld [vmem:[#allocation7 + $0x38] sm:$0xff]  }
  0x5d   :  { %964 = vmatpush3.bf16.msra.mxu1 %v1085_v19  ;;  %v1128_v2 = vld [vmem:[#allocation8] sm:$0xff]   ;;  %v1129_v3 = vld [vmem:[#allocation8 + $0x8] sm:$0xff]   ;;  %v1130_v4 = vld [vmem:[#allocation8 + $0x10] sm:$0xff]  }
  0x5e   :  { %965 = vmatprep.subr.bf16.mxu1 %v1088_v22  ;;  %v1131_v5 = vld [vmem:[#allocation8 + $0x18] sm:$0xff]   ;;  %v1132_v6 = vld [vmem:[#allocation8 + $0x20] sm:$0xff]   ;;  %v1133_v7 = vld [vmem:[#allocation8 + $0x28] sm:$0xff]  }
  0x5f   :  { %944 = vmatpush3.bf16.msra.mxu0 %v1087_v21  ;;  %v860_v9 = vld [vmem:[%s1401_s2] ss:$0 sm:$0xff] }
  0x60   :  { %945 = vmatprep.subr.bf16.mxu0 %v1090_v24  ;;  %v915_v31 = vld [vmem:[%s1403_s4] ss:$0 sm:$0xff]  ;;  %s1224_s4 = scalar_lea.vmem %s850_s29, 128 }
  0x61   :  { %966 = vmatpush3.bf16.msra.mxu1 %v1089_v23  ;;  %p1225_p4 = scmp.ne.s32.totalorder %s850_s29, %s1224_s4  ;;  %p1230_p6 = scmp.lt.s32.totalorder %s1224_s4, %s1224_s4 }
  0x62   :  { %967 = vmatprep.subr.bf16.mxu1 %v1092_v26 }
  0x63   :  { %946 = vmatpush3.bf16.msra.mxu0 %v1091_v25  ;;  %p1231_p7 = por %p1230_p6, %p1229_p5 }
  0x64   :  { %947 = vmatprep.subr.bf16.mxu0 %v1094_v28 }
  0x65   :  { %968 = vmatpush3.bf16.msra.mxu1 %v1093_v27  ;;  %p1232_p8 = pnand %p1231_p7, %p1225_p4 }
  0x66   :  { %969 = vmatprep.subr.bf16.mxu1 %v1096_v30  ;;  %v1135_v30 = vld [vmem:[#allocation8 + $0x38] sm:$0xff]  }
  0x67   :  { %948 = vmatpush3.bf16.msra.mxu0 %v1095_v29  ;;  %v1134_v29 = vld [vmem:[#allocation8 + $0x30] sm:$0xff]  }
  0x68   :  { %977 = vmatprep.subr.bf16.mxu0 %v1100_v35 }
  0x69   :  { %970 = vmatpush3.bf16.msra.mxu1 %v1099_v34 }
  0x6a   :  { %529 = vmatmul.mubr.bf16.vlgmr.msra.gmra.mrb[0].mxu0 %v861_v32  ;;  %1017 = vmatprep.subr.bf16.mxu1 %v1260_v58 }
  0x6b   :  { %978 = vmatpush3.bf16.msra.mxu0 %v1103_v39  ;;  %608 = vmatprep.mubr.bf16.mxu0 %v866_v50  ;;  %v924_v39 = vld [vmem:[%s1405_s6] ss:$0 sm:$0xff] }
  0x6c   :  { %569 = vmatmul.mubr.bf16.vlgmr.msra.gmra.mrb[0].mxu1 %v863_v37  ;;  %979 = vmatprep.subr.bf16.mxu0 %v1104_v40 }
  0x6d   :  { %1018 = vmatpush3.bf16.msra.mxu1 %v1120_v57  ;;  %1033 = vmatprep.mubr.msk.bf16.mxu1 %vm1261_vm0, %v1260_v58 }
  0x6e   :  { %1019 = vmatprep.subr.bf16.mxu1 %v1260_v58 }
  0x6f   :  { %980 = vmatpush3.bf16.msra.mxu0 %v1105_v41 }
  0x70   :  { %981 = vmatprep.subr.bf16.mxu0 %v1106_v42 }
  0x71   :  { %1020 = vmatpush3.bf16.msra.mxu1 %v1121_v59 }
  0x72   :  { %1021 = vmatprep.subr.bf16.mxu1 %v1260_v58 }
  0x73   :  { %982 = vmatpush3.bf16.msra.mxu0 %v1107_v43 }
  0x74   :  { %983 = vmatprep.subr.bf16.mxu0 %v1108_v44 }
  0x75   :  { %1022 = vmatpush3.bf16.msra.mxu1 %v1122_v60 }
  0x76   :  { %1023 = vmatprep.subr.bf16.mxu1 %v1260_v58 }
  0x77   :  { %984 = vmatpush3.bf16.msra.mxu0 %v1109_v45 }
  0x78   :  { %985 = vmatprep.subr.bf16.mxu0 %v1110_v46 }
  0x79   :  { %1024 = vmatpush3.bf16.msra.mxu1 %v1123_v61 }
  0x7a   :  { %1025 = vmatprep.subr.bf16.mxu1 %v1260_v58 }
  0x7b   :  { %986 = vmatpush3.bf16.msra.mxu0 %v1111_v47 }
  0x7c   :  { %987 = vmatprep.subr.bf16.mxu0 %v1112_v48 }
  0x7d   :  { %1026 = vmatpush3.bf16.msra.mxu1 %v1124_v62 }
  0x7e   :  { %1027 = vmatprep.subr.bf16.mxu1 %v1260_v58 }
  0x7f   :  { %988 = vmatpush3.bf16.msra.mxu0 %v1113_v51 }
  0x80   :  { %989 = vmatprep.subr.bf16.mxu0 %v1114_v52 }
  0x81   :  { %1028 = vmatpush3.bf16.msra.mxu1 %v1125_v63 }
  0x82   :  { %1029 = vmatprep.subr.bf16.mxu1 %v1260_v58 }
  0x83   :  { %990 = vmatpush3.bf16.msra.mxu0 %v1115_v53 }
  0x84   :  { %991 = vmatprep.subr.bf16.mxu0 %v1116_v54 }
  0x85   :  { %1030 = vmatpush3.bf16.msra.mxu1 %v1126_v0 }
  0x86   :  { %1031 = vmatprep.subr.bf16.mxu1 %v1260_v58 }
  0x87   :  { %992 = vmatpush3.bf16.msra.mxu0 %v1117_v55 }
  0x88   :  { %1037 = vmatprep.subr.bf16.mxu0 %v1260_v58 }
  0x89   :  { %1032 = vmatpush3.bf16.msra.mxu1 %v1127_v1 }
  0x8a   :  { %609 = vmatmul.mubr.bf16.vlgmr.msra.gmra.mrb[4].mxu0 %v865_v56 }
  0x8b   :  { %1053 = vmatprep.mubr.msk.bf16.mxu0 %vm1261_vm0, %v1260_v58  ;;  %1038 = vmatpush3.bf16.msra.mxu0 %v1128_v2 }
  0x8c   :  { %1039 = vmatprep.subr.bf16.mxu0 %v1260_v58 }
  0x8f   :  { %1040 = vmatpush3.bf16.msra.mxu0 %v1129_v3 }
  0x90   :  { %1041 = vmatprep.subr.bf16.mxu0 %v1260_v58 }
  0x93   :  { %1042 = vmatpush3.bf16.msra.mxu0 %v1130_v4 }
  0x94   :  { %1043 = vmatprep.subr.bf16.mxu0 %v1260_v58 }
  0x97   :  { %1044 = vmatpush3.bf16.msra.mxu0 %v1131_v5 }
  0x98   :  { %1045 = vmatprep.subr.bf16.mxu0 %v1260_v58 }
  0x9b   :  { %1046 = vmatpush3.bf16.msra.mxu0 %v1132_v6 }
  0x9c   :  { %1047 = vmatprep.subr.bf16.mxu0 %v1260_v58 }
  0x9f   :  { %1048 = vmatpush3.bf16.msra.mxu0 %v1133_v7 }
  0xa0   :  { %1049 = vmatprep.subr.bf16.mxu0 %v1260_v58 }
  0xa3   :  { %1050 = vmatpush3.bf16.msra.mxu0 %v1134_v29 }
  0xa4   :  { %1051 = vmatprep.subr.bf16.mxu0 %v1260_v58 }
  0xa7   :  { %1052 = vmatpush3.bf16.msra.mxu0 %v1135_v30 }
 0x13d   :  { %v949_v8 = vpop.f32.mrb[0].mxu0 }
 0x13e   :  { %v950_v10 = vpop.f32.mrb[1].mxu0 }
 0x13f   :  { %v951_v11 = vadd.f32 %v950_v10, %v949_v8  ;;  %v952_v12 = vpop.f32.mrb[2].mxu0  ;;  %v971_v13 = vpop.f32.mrb[0].mxu1 }
 0x140   :  { %v953_v14 = vpop.f32.mrb[3].mxu0  ;;  %v972_v15 = vpop.f32.mrb[1].mxu1 }
 0x141   :  { %v531_v16 = vadd.f32 %v951_v11, %v860_v9  ;;  %v973_v17 = vadd.f32 %v972_v15, %v971_v13  ;;  %v974_v18 = vpop.f32.mrb[2].mxu1 }
 0x142   :  { %v975_v19 = vpop.f32.mrb[3].mxu1 }
 0x143   :  { %v571_v20 = vadd.f32 %v973_v17, %v531_v16 }
 0x15d   :  { %v993_v21 = vpop.f32.mrb[4].mxu0 }
 0x15e   :  { %v994_v22 = vpop.f32.mrb[5].mxu0 }
 0x15f   :  { %v995_v23 = vadd.f32 %v994_v22, %v993_v21  ;;  %v996_v24 = vpop.f32.mrb[6].mxu0 }
 0x160   :  { %v997_v25 = vpop.f32.mrb[7].mxu0 }
 0x161   :  { %v611_v26 = vadd.f32 %v995_v23, %v571_v20 }
 0x163   :  { %v616_v27 = vmax.f32 %v611_v26, 0.0 }
 0x165   :  { %v617_v28 = vpack.c.bf16 %v616_v27, %v616_v27 }
 0x167   :  { %1034 = vmatmul.mubr.bf16.vlgmr.msra.gmra.mrb[4].mxu1 %v617_v28 }
 0x23a   :  { %v723_v32 = vpop.f32.mrb[4].mxu1 }
 0x23b   :  { %v724_v33 = vadd.f32 %v915_v31, %v723_v32  ;;  %v1035_v34 = vpop.f32.mrb[5].mxu1 }
 0x23c   :  { %v726_v35 = vpop.f32.mrb[6].mxu1 }
 0x23d   :  { %v729_v36 = vmax.f32 %v724_v33, 0.0  ;;  %v1036_v37 = vpop.f32.mrb[7].mxu1 }
 0x23f   :  { %v730_v38 = vpack.c.bf16 %v729_v36, %v729_v36 }
 0x241   :  { %1054 = vmatmul.mubr.bf16.vlgmr.msra.gmra.mrb[8].mxu0 %v730_v38 }
 0x314   :  { %v836_v40 = vpop.f32.mrb[8].mxu0 }
 0x315   :  { %v837_v41 = vadd.f32 %v924_v39, %v836_v40  ;;  %v1055_v42 = vpop.f32.mrb[9].mxu0 }
 0x316   :  { %v839_v43 = vpop.f32.mrb[10].mxu0 }
 0x317   :  { %842 = vst [vmem:[#allocation10] sm:$0xff] %v837_v41  ;;  %v1056_v44 = vpop.f32.mrb[11].mxu0 }
 0x318   :  { %1235 = shalt.err (!%p1232_p8)
}
 0x319   :  { %s1236_s6 = scalar_lea.hbm %s1406_s7, 128 }
 0x31a   :  { %p1237_p9 = scmp.ne.s32.totalorder %s1406_s7, %s1236_s6  ;;  %p1240_p10 = scmp.lt.u32.totalorder %s1236_s6, %s1406_s7 }
 0x31c   :  { %p1242_p11 = pnand %p1240_p10, %p1237_p9 }
 0x31e   :  { %1245 = shalt.err (!%p1242_p11)
}
 0x31f   :  { %852 = dma.vmem_to_hbm [thread:$0]  %s850_s29, 128, %s1406_s7, [#allocation4]  }
 0x320   :  { %1252 = dma.done.wait [#allocation4], 128  }
 0x321   :  { %1253 = vsyncadd [#allocation4], 4294967168 }
 0x322   :  { %856 = vsyncpa [#allocation3], 1 }
 0x323   :  { %857 = vsyncpa [#allocation6], 1 }
 0x324   :  { %858 = vsyncpa [#allocation9], 1 }
 0x325   :  { %859 = vsyncpa [#allocation4], 1 }

</bundles_post_ra>
